<compile_context>
chip_gen: v5e
topology: v5e:2x2
jax: 0.10.0
libtpu: 0.0.40
codegen_flags: <defaults>
</compile_context>

<pallas_src>
import functools

import jax
import jax.numpy as jnp
from jax.experimental import pallas as pl
from jax.experimental.pallas import tpu as pltpu

EPS = 1e-5  # nn.LayerNorm default


# ----------------------------------------------------------------------------
# Small helpers
# ----------------------------------------------------------------------------
def _round_up(x, m):
    return (x + m - 1) // m * m


def _round_down(x, m):
    return x // m * m


def _cdiv(a, b):
    return -(-a // b)


def _vmem_capacity_bytes():
    """Physical VMEM per TensorCore (v5e/v6e: 128 MiB, v7x: 64 MiB)."""
    try:
        info = pltpu.get_tpu_info()
        for name in ("vmem_capacity_bytes", "vmem_size_bytes", "vmem_bytes"):
            cap = getattr(info, name, None)
            if cap:
                return int(cap)
    except Exception:
        pass
    return 64 * 1024 * 1024  # conservative fallback (v7x size) — safe everywhere


def _largest_dividing_tile(d_pad, max_tk):
    """Largest multiple of 128 that divides d_pad and is <= max_tk."""
    m = d_pad // 128
    best = 128
    for q in range(1, m + 1):
        if m % q == 0 and 128 * q <= max_tk:
            best = 128 * q
    return best


# ----------------------------------------------------------------------------
# Kernels
# ----------------------------------------------------------------------------
def _layernorm_epilogue(y, gamma, beta, d_true, d_pad):
    """LayerNorm over the last axis of f32 `y` (true width d_true <= d_pad).

    Padded columns of y are exactly zero (zero-padded W columns / bias), so the
    mean over the padded width equals the mean over the true width. Variance is
    two-pass (mean subtracted first); padded lanes are masked out so they do
    not contribute (y - mean != 0 there).
    """
    inv_d = 1.0 / float(d_true)
    mean = jnp.sum(y, axis=-1, keepdims=True) * inv_d
    centered = y - mean
    if d_true != d_pad:
        col = jax.lax.broadcasted_iota(jnp.int32, y.shape, dimension=y.ndim - 1)
        centered = jnp.where(col < d_true, centered, 0.0)
    var = jnp.sum(centered * centered, axis=-1, keepdims=True) * inv_d
    y_hat = centered * jax.lax.rsqrt(var + EPS)
    return y_hat * gamma + beta


def _postnorm_fused_kernel(x_ref, w_ref, b_ref, g_ref, be_ref, o_ref, *,
                           d_true, d_pad, precision):
    """Single-K-chunk path: W fully VMEM-resident, no accumulator scratch."""
    y = jnp.dot(x_ref[...], w_ref[...],
                preferred_element_type=jnp.float32, precision=precision)
    y = y + b_ref[...].astype(jnp.float32)
    out = _layernorm_epilogue(y,
                              g_ref[...].astype(jnp.float32),
                              be_ref[...].astype(jnp.float32),
                              d_true, d_pad)
    o_ref[...] = out.astype(o_ref.dtype)


def _postnorm_ktiled_kernel(x_ref, w_ref, b_ref, g_ref, be_ref, o_ref, acc_ref,
                            *, d_true, d_pad, precision):
    """K-tiled fallback (huge D): f32 accumulator persists across the k axis."""
    k = pl.program_id(1)

    @pl.when(k == 0)
    def _():
        acc_ref[...] = jnp.zeros_like(acc_ref)

    acc_ref[...] += jnp.dot(x_ref[...], w_ref[...],
                            preferred_element_type=jnp.float32,
                            precision=precision)

    @pl.when(k == pl.num_programs(1) - 1)
    def _():
        y = acc_ref[...] + b_ref[...].astype(jnp.float32)
        out = _layernorm_epilogue(y,
                                  g_ref[...].astype(jnp.float32),
                                  be_ref[...].astype(jnp.float32),
                                  d_true, d_pad)
        o_ref[...] = out.astype(o_ref.dtype)


# ----------------------------------------------------------------------------
# Wrapper
# ----------------------------------------------------------------------------
def postnorm_init(w, b, gamma, beta):
    """Pad Linear/LayerNorm parameters to a lane-dense width once (at init).

    `w` is stored as (in, out), i.e. the transpose of the torch nn.Linear
    weight. Padding is hoisted out of the per-step path; when D is already a
    multiple of 128 no copy is made.
    """
    d = w.shape[0]
    assert w.shape == (d, d)
    d_pad = _round_up(d, 128)
    if d_pad != d:
        w2 = jnp.zeros((d_pad, d_pad), w.dtype).at[:d, :d].set(w)
        b2 = jnp.zeros((1, d_pad), b.dtype).at[0, :d].set(b)
        g2 = jnp.zeros((1, d_pad), gamma.dtype).at[0, :d].set(gamma)
        be2 = jnp.zeros((1, d_pad), beta.dtype).at[0, :d].set(beta)
    else:
        w2 = w
        b2 = b.reshape(1, d_pad)
        g2 = gamma.reshape(1, d_pad)
        be2 = beta.reshape(1, d_pad)
    return (w2, b2, g2, be2, d)


def postnorm_apply(x, params, *, max_tile_rows=512, max_tile_k=512,
                   precision=None):
    """LayerNorm(x @ w + b) with gamma/beta, eps=1e-5 (PostNorm forward).

    x: (batch, seq, D). `params` comes from postnorm_init. `precision` is
    forwarded to the MXU matmul (pass jax.lax.Precision.HIGHEST for
    bit-faithful f32 Linear output at extra MXU cost).
    """
    w2, b2, g2, be2, d = params
    d_pad = w2.shape[0]
    batch, seq, d_in = x.shape
    assert d_in == d, "embedding dim mismatch between x and parameters"
    rows = batch * seq

    x_it = x.dtype.itemsize
    w_it = w2.dtype.itemsize
    o_it = x_it
    # Sublane packing: 8 rows/vreg for 4-byte, 16 for 2-byte, 32 for 1-byte.
    row_align = max(8, 32 // x_it)

    # ---- Per-generation VMEM budget -----------------------------------------
    vmem_cap = _vmem_capacity_bytes()
    vmem_limit = int(vmem_cap * 0.85)   # leave headroom for compiler scratch
    tile_budget = int(vmem_cap * 0.70)  # budget for our own tiles

    small_bytes = 2 * 3 * d_pad * w_it + 4096  # bias/gamma/beta (dbl-buffered)

    def fused_fp(tr):
        return (2 * d_pad * d_pad * w_it       # W (worst-case double-buffered)
                + 2 * tr * d_pad * x_it        # x tiles
                + 2 * tr * d_pad * o_it        # out tiles
                + 2 * tr * d_pad * 4           # f32 dot result + epilogue temps
                + small_bytes)

    def ktiled_fp(tr, tk):
        return (2 * tk * d_pad * w_it          # W slab
                + 2 * tr * tk * x_it           # x tiles
                + 2 * tr * d_pad * o_it        # out tiles
                + tr * d_pad * 4               # f32 accumulator scratch
                + 2 * tr * d_pad * 4           # epilogue temps
                + small_bytes)

    def shrink(tr):
        return max(row_align, _round_down(tr // 2, row_align))

    # ---- Row tile cap: keep >= 2 row tiles so v7x's 2 TCs both get work -----
    rows_aligned = _round_up(rows, row_align)
    tr_cap = rows_aligned
    if rows_aligned >= 2 * row_align:
        tr_cap = max(row_align, _round_down(rows_aligned // 2, row_align))
    tr_cap = min(tr_cap, max(row_align, _round_up(max_tile_rows, row_align)))

    # ---- Preferred schedule: W fully VMEM-resident, single K chunk ----------
    tr = tr_cap
    while tr > row_align and fused_fp(tr) > tile_budget:
        tr = shrink(tr)

    if fused_fp(tr) <= tile_budget:
        tile_rows, tile_k = tr, d_pad
    else:
        # ---- Fallback: K-tiled accumulation (very large D). tile_k | d_pad. -
        # (If profiling shows exposed W-slab DMA on v5e, pl.Buffered(3) on the
        #  W BlockSpec would hide the refetch; omitted here for simplicity.)
        tk = _largest_dividing_tile(d_pad, _round_up(max_tile_k, 128))
        while True:
            tr = tr_cap
            while tr > row_align and ktiled_fp(tr, tk) > tile_budget:
                tr = shrink(tr)
            if ktiled_fp(tr, tk) <= tile_budget or tk == 128:
                break
            tk = _largest_dividing_tile(d_pad, tk - 128)
        tile_rows, tile_k = tr, tk

    # ---- Rebalance row tiles to minimize padding (never grows the tile) -----
    num_row_tiles = _cdiv(rows_aligned, tile_rows)
    tile_rows = _round_up(_cdiv(rows_aligned, num_row_tiles), row_align)
    rows_pad = num_row_tiles * tile_rows

    # ---- Pad activations only when required ----------------------------------
    x2 = x.reshape(rows, d)
    needs_pad = (rows_pad != rows) or (d_pad != d)
    if needs_pad:
        x2 = jnp.pad(x2, ((0, rows_pad - rows), (0, d_pad - d)))

    num_k = d_pad // tile_k

    if num_k == 1:
        kernel = functools.partial(_postnorm_fused_kernel,
                                   d_true=d, d_pad=d_pad, precision=precision)
        grid = (num_row_tiles,)
        in_specs = [
            pl.BlockSpec((tile_rows, d_pad), lambda i: (i, 0)),   # x
            pl.BlockSpec((d_pad, d_pad), lambda i: (0, 0)),       # W (resident)
            pl.BlockSpec((1, d_pad), lambda i: (0, 0)),           # bias
            pl.BlockSpec((1, d_pad), lambda i: (0, 0)),           # gamma
            pl.BlockSpec((1, d_pad), lambda i: (0, 0)),           # beta
        ]
        out_specs = pl.BlockSpec((tile_rows, d_pad), lambda i: (i, 0))
        scratch_shapes = []
        dim_sem = ("parallel",)
        w_bytes = d_pad * d_pad * w_it
    else:
        kernel = functools.partial(_postnorm_ktiled_kernel,
                                   d_true=d, d_pad=d_pad, precision=precision)
        grid = (num_row_tiles, num_k)
        in_specs = [
            pl.BlockSpec((tile_rows, tile_k), lambda i, k: (i, k)),  # x
            pl.BlockSpec((tile_k, d_pad), lambda i, k: (k, 0)),      # W slab
            pl.BlockSpec((1, d_pad), lambda i, k: (0, 0)),           # bias
            pl.BlockSpec((1, d_pad), lambda i, k: (0, 0)),           # gamma
            pl.BlockSpec((1, d_pad), lambda i, k: (0, 0)),           # beta
        ]
        out_specs = pl.BlockSpec((tile_rows, d_pad), lambda i, k: (i, 0))
        scratch_shapes = [pltpu.VMEM((tile_rows, d_pad), jnp.float32)]
        dim_sem = ("parallel", "arbitrary")
        w_bytes = num_row_tiles * d_pad * d_pad * w_it  # W re-streamed per row tile

    bytes_accessed = (rows_pad * d_pad * x_it + w_bytes
                      + rows_pad * d_pad * o_it + 6 * d_pad * w_it)

    out = pl.pallas_call(
        kernel,
        out_shape=jax.ShapeDtypeStruct((rows_pad, d_pad), x.dtype),
        grid_spec=pltpu.PrefetchScalarGridSpec(
            num_scalar_prefetch=0,
            grid=grid,
            in_specs=in_specs,
            out_specs=out_specs,
            scratch_shapes=scratch_shapes,
        ),
        compiler_params=pltpu.CompilerParams(
            dimension_semantics=dim_sem,
            vmem_limit_bytes=vmem_limit,
        ),
        cost_estimate=pl.CostEstimate(
            flops=2 * rows_pad * d_pad * d_pad,
            transcendentals=rows_pad,            # one rsqrt per row
            bytes_accessed=bytes_accessed,
        ),
    )(x2, w2, b2, g2, be2)

    if needs_pad:
        out = out[:rows, :d]
    return out.reshape(batch, seq, d)


def postnorm(x, w, b, gamma, beta, **kwargs):
    """Convenience: pad params and apply (prefer postnorm_init + _apply)."""
    return postnorm_apply(x, postnorm_init(w, b, gamma, beta), **kwargs)


# ----------------------------------------------------------------------------
# Pure-JAX reference
# ----------------------------------------------------------------------------
def postnorm_ref(x, w, b, gamma, beta):
    xf = x.astype(jnp.float32)
    y = jnp.einsum("bsd,de->bse", xf, w.astype(jnp.float32)) \
        + b.astype(jnp.float32)
    mean = jnp.mean(y, axis=-1, keepdims=True)
    var = jnp.mean((y - mean) ** 2, axis=-1, keepdims=True)
    return ((y - mean) * jax.lax.rsqrt(var + EPS)) * gamma.astype(jnp.float32) \
        + beta.astype(jnp.float32)


if __name__ == "__main__":
    # ---- Case 1: f32, small demo shapes -------------------------------------
    key = jax.random.PRNGKey(0)
    batch, seq, embed = 2, 8, 32

    k_x, k_w, k_b = jax.random.split(key, 3)
    x = jax.random.normal(k_x, (batch, seq, embed), dtype=jnp.float32)
    # Linear weight stored as (in, out), i.e. torch weight transposed.
    w = jax.random.normal(k_w, (embed, embed), dtype=jnp.float32) \
        * (1.0 / jnp.sqrt(embed))
    b = jax.random.normal(k_b, (embed,), dtype=jnp.float32) * 0.01
    gamma = jnp.ones((embed,), dtype=jnp.float32)   # LayerNorm weight init
    beta = jnp.zeros((embed,), dtype=jnp.float32)   # LayerNorm bias init

    params = postnorm_init(w, b, gamma, beta)        # padded once (hoisted)
    out = jax.block_until_ready(postnorm_apply(x, params))
    ref = postnorm_ref(x, w, b, gamma, beta)
    err = float(jnp.max(jnp.abs(out - ref)))
    assert out.shape == ref.shape
    assert jnp.allclose(out, ref, atol=2e-2, rtol=2e-2), \
        f"f32 mismatch vs ref (max abs err {err})"

    # ---- Case 2: bf16, unaligned rows/embed (padding + mask + bf16 MXU) -----
    batch2, seq2, embed2 = 3, 40, 48
    k_x2, k_w2, k_b2 = jax.random.split(jax.random.PRNGKey(1), 3)
    xb = jax.random.normal(k_x2, (batch2, seq2, embed2),
                           dtype=jnp.float32).astype(jnp.bfloat16)
    wb = (jax.random.normal(k_w2, (embed2, embed2), dtype=jnp.float32)
          * (1.0 / jnp.sqrt(embed2))).astype(jnp.bfloat16)
    bb = (jax.random.normal(k_b2, (embed2,), dtype=jnp.float32)
          * 0.01).astype(jnp.bfloat16)
    gb = jnp.ones((embed2,), dtype=jnp.bfloat16)
    beb = jnp.zeros((embed2,), dtype=jnp.bfloat16)

    params_b = postnorm_init(wb, bb, gb, beb)
    outb = jax.block_until_ready(postnorm_apply(xb, params_b))
    refb = postnorm_ref(xb, wb, bb, gb, beb)
    errb = float(jnp.max(jnp.abs(outb.astype(jnp.float32) - refb)))
    assert jnp.allclose(outb.astype(jnp.float32), refb, atol=1e-1, rtol=1e-1), \
        f"bf16 mismatch vs ref (max abs err {errb})"

    print("KERNEL_OK")
</pallas_src>

<mosaic_0001>
module attributes {stable_mosaic.version = 11 : i64} {
  func.func @_postnorm_fused_kernel(%arg0: i32, %arg1: memref<8x128xf32, #tpu.memory_space<vmem>>, %arg2: memref<128x128xf32, #tpu.memory_space<vmem>>, %arg3: memref<1x128xf32, #tpu.memory_space<vmem>>, %arg4: memref<1x128xf32, #tpu.memory_space<vmem>>, %arg5: memref<1x128xf32, #tpu.memory_space<vmem>>, %arg6: memref<8x128xf32, #tpu.memory_space<vmem>>) attributes {dimension_semantics = [#tpu.dimension_semantics<parallel>], iteration_bounds = array<i64: 2>, scalar_prefetch = 0 : i64, scratch_operands = 0 : i64, tpu.core_type = #tpu.core_type<tc>, window_params = [{transform_indices = @transform_0, window_bounds = array<i64: 8, 128>}, {pipeline_mode = #tpu.pipeline_mode<synchronous>, transform_indices = @transform_1, window_bounds = array<i64: 128, 128>}, {pipeline_mode = #tpu.pipeline_mode<synchronous>, transform_indices = @transform_2, window_bounds = array<i64: 1, 128>}, {pipeline_mode = #tpu.pipeline_mode<synchronous>, transform_indices = @transform_3, window_bounds = array<i64: 1, 128>}, {pipeline_mode = #tpu.pipeline_mode<synchronous>, transform_indices = @transform_4, window_bounds = array<i64: 1, 128>}, {transform_indices = @transform_5, window_bounds = array<i64: 8, 128>}]} {
    %c0 = arith.constant 0 : index
    %c0_0 = arith.constant 0 : index
    %0 = vector.load %arg1[%c0, %c0_0] : memref<8x128xf32, #tpu.memory_space<vmem>>, vector<8x128xf32>
    %c0_1 = arith.constant 0 : index
    %c0_2 = arith.constant 0 : index
    %1 = vector.load %arg2[%c0_1, %c0_2] : memref<128x128xf32, #tpu.memory_space<vmem>>, vector<128x128xf32>
    %cst = arith.constant dense<0.000000e+00> : vector<8x128xf32>
    %2 = tpu.matmul %0, %1, %cst {dimension_numbers = #tpu.dot_dimension_numbers<[1], [0], [0], [1], [0, 0, 1, 1], [], []>} : vector<8x128xf32>, vector<128x128xf32>, vector<8x128xf32> -> vector<8x128xf32>
    %c0_3 = arith.constant 0 : index
    %c0_4 = arith.constant 0 : index
    %3 = vector.load %arg3[%c0_3, %c0_4] : memref<1x128xf32, #tpu.memory_space<vmem>>, vector<1x128xf32>
    %4 = vector.broadcast %3 : vector<1x128xf32> to vector<8x128xf32>
    %5 = arith.addf %2, %4 : vector<8x128xf32>
    %c0_5 = arith.constant 0 : index
    %c0_6 = arith.constant 0 : index
    %6 = vector.load %arg4[%c0_5, %c0_6] : memref<1x128xf32, #tpu.memory_space<vmem>>, vector<1x128xf32>
    %c0_7 = arith.constant 0 : index
    %c0_8 = arith.constant 0 : index
    %7 = vector.load %arg5[%c0_7, %c0_8] : memref<1x128xf32, #tpu.memory_space<vmem>>, vector<1x128xf32>
    %cst_9 = arith.constant dense<0.000000e+00> : vector<8xf32>
    %8 = vector.multi_reduction <add>, %5, %cst_9 [1] : vector<8x128xf32> to vector<8xf32>
    %9 = vector.shape_cast %8 : vector<8xf32> to vector<8x1xf32>
    %cst_10 = arith.constant 3.125000e-02 : f32
    %10 = vector.broadcast %cst_10 : f32 to vector<8x1xf32>
    %11 = arith.mulf %9, %10 : vector<8x1xf32>
    %12 = vector.broadcast %11 : vector<8x1xf32> to vector<8x128xf32>
    %13 = arith.subf %5, %12 : vector<8x128xf32>
    %14 = tpu.iota {dimensions = array<i32: 1>} : vector<8x128xi32>
    %c32_i32 = arith.constant 32 : i32
    %15 = vector.broadcast %c32_i32 : i32 to vector<8x128xi32>
    %16 = arith.cmpi slt, %14, %15 : vector<8x128xi32>
    %cst_11 = arith.constant 0.000000e+00 : f32
    %17 = vector.broadcast %cst_11 : f32 to vector<8x128xf32>
    %18 = arith.select %16, %13, %17 : vector<8x128xi1>, vector<8x128xf32>
    %19 = arith.mulf %18, %18 : vector<8x128xf32>
    %cst_12 = arith.constant dense<0.000000e+00> : vector<8xf32>
    %20 = vector.multi_reduction <add>, %19, %cst_12 [1] : vector<8x128xf32> to vector<8xf32>
    %21 = vector.shape_cast %20 : vector<8xf32> to vector<8x1xf32>
    %cst_13 = arith.constant 3.125000e-02 : f32
    %22 = vector.broadcast %cst_13 : f32 to vector<8x1xf32>
    %23 = arith.mulf %21, %22 : vector<8x1xf32>
    %cst_14 = arith.constant 9.99999974E-6 : f32
    %24 = vector.broadcast %cst_14 : f32 to vector<8x1xf32>
    %25 = arith.addf %23, %24 : vector<8x1xf32>
    %26 = math.rsqrt %25 : vector<8x1xf32>
    %27 = vector.broadcast %26 : vector<8x1xf32> to vector<8x128xf32>
    %28 = arith.mulf %18, %27 : vector<8x128xf32>
    %29 = vector.broadcast %6 : vector<1x128xf32> to vector<8x128xf32>
    %30 = arith.mulf %28, %29 : vector<8x128xf32>
    %31 = vector.broadcast %7 : vector<1x128xf32> to vector<8x128xf32>
    %32 = arith.addf %30, %31 : vector<8x128xf32>
    %c0_15 = arith.constant 0 : index
    %c0_16 = arith.constant 0 : index
    %33 = vector.load %arg6[%c0_15, %c0_16] : memref<8x128xf32, #tpu.memory_space<vmem>>, vector<8x128xf32>
    tpu.vector_store %arg6[%c0_15, %c0_16], %32 {strides = array<i32>} : memref<8x128xf32, #tpu.memory_space<vmem>>, vector<8x128xf32>,
    return
  }
  func.func @transform_0(%arg0: i32) -> (i32, i32) {
    %c0_i32 = arith.constant 0 : i32
    %c0_i32_0 = arith.constant 0 : i32
    return %arg0, %c0_i32 : i32, i32
  }
  func.func @transform_1(%arg0: i32) -> (i32, i32) {
    %c0_i32 = arith.constant 0 : i32
    %c0_i32_0 = arith.constant 0 : i32
    %c0_i32_1 = arith.constant 0 : i32
    return %c0_i32, %c0_i32_0 : i32, i32
  }
  func.func @transform_2(%arg0: i32) -> (i32, i32) {
    %c0_i32 = arith.constant 0 : i32
    %c0_i32_0 = arith.constant 0 : i32
    %c0_i32_1 = arith.constant 0 : i32
    return %c0_i32, %c0_i32_0 : i32, i32
  }
  func.func @transform_3(%arg0: i32) -> (i32, i32) {
    %c0_i32 = arith.constant 0 : i32
    %c0_i32_0 = arith.constant 0 : i32
    %c0_i32_1 = arith.constant 0 : i32
    return %c0_i32, %c0_i32_0 : i32, i32
  }
  func.func @transform_4(%arg0: i32) -> (i32, i32) {
    %c0_i32 = arith.constant 0 : i32
    %c0_i32_0 = arith.constant 0 : i32
    %c0_i32_1 = arith.constant 0 : i32
    return %c0_i32, %c0_i32_0 : i32, i32
  }
  func.func @transform_5(%arg0: i32) -> (i32, i32) {
    %c0_i32 = arith.constant 0 : i32
    %c0_i32_0 = arith.constant 0 : i32
    return %arg0, %c0_i32 : i32, i32
  }
}

</mosaic_0001>

<bundles_post_ra>
// kernel: tpu_custom_call.1
= control target key start
LH: loop header
LB: loop body
LE: loop exit
PB: predicated region body
PF: predicated region fallthrough
CT: control target
= control target key end

     0   :  { %10 = vsyncpa [#allocation3], 0  ;;  %s826_s0 = inlined_call_operand.hbm [shape: f32[16,128], index: 0, kind: input, shape index: {}]   ;;  %s827_s1 = inlined_call_operand.hbm [shape: f32[128,128], index: 1, kind: input, shape index: {}]   ;;  %s828_s2 = inlined_call_operand.vmem [shape: f32[1,128], index: 2, kind: input, shape index: {}]   ;;  %s829_s3 = inlined_call_operand.vmem [shape: f32[1,128], index: 3, kind: input, shape index: {}]   ;;  %s830_s4 = inlined_call_operand.vmem [shape: f32[1,128], index: 4, kind: input, shape index: {}]   ;;  %s831_s5 = inlined_call_operand.hbm [shape: f32[16,128], index: 5, kind: output, shape index: {}]  }
   0x1   :  { %12 = vsyncpa [#allocation3 + $0x1], 0 }
   0x2   :  { %13 = vsyncpa [#allocation6], 0 }
   0x3   :  { %14 = vsyncpa [#allocation4], 0 }
   0x4   :  { %16 = vsyncpa [#allocation4 + $0x1], 0  ;;  %s674_s18 = smov 0   ;;  %s676_s19 = smov 0  }
   0x5   :  { %s678_s20 = smov 0   ;;  %s680_s21 = smov 0  }
   0x6 LB: > { %s174_s24 = sshll.u32 %s827_s1, 4  ;;  %s698_s25 = sadd.s32 4294967295, %s639_s21   ;;  %s639_s21 = sphi %s680_s21, %s841_s21   ;;  %s635_s20 = sphi %s678_s20, %s840_s20   ;;  %s631_s19 = sphi %s676_s19, %s839_s19   ;;  %s627_s18 = sphi %s674_s18, %s838_s18   ;;  %s175_s24 = int_to_ptr.hbm [resolvable:$true] %s174_s24 }
   0x7   : > { %p432_p0 = scmp.ge.s32.totalorder %s639_s21, 1  ;;  %p43_p1 = scmp.eq.s32.totalorder %s698_s25, 0 }
   0x8   : > { %p163_p2 = scmp.lt.s32.totalorder %s639_s21, 3  ;;  %s641_s27 = smov [#allocation5]  }
   0x9   : > { %s176_s28 = sshll.u32 %s641_s27, 4  ;;  %s642_s29 = smov 128   ;;  %s177_s28 = int_to_ptr.vmem [resolvable:$true] %s176_s28 }
   0xa   : > { %p703_p3 = pnand %p432_p0, %p163_p2  ;;  %s643_s30 = smov 8  }
   0xb   : > { %s431_s6 = sadd.s32 4294967294, %s639_s21   ;;  %s714_s7 = sadd.s32 1, %s639_s21  }
   0xc   : > { %p453_p4 = pneg %p703_p3  ;;  %s29_s8 = sadd.s32 1, %s635_s20 }
   0xd   : > { %s26_s9 = ssub.s32 %s639_s21, %s714_s7  ;;  %p36_p7 = scmp.ne.s32.totalorder %s635_s20, %s631_s19 }
   0xe   : > { %p454_p6 = pnand %p453_p4, %p43_p1  ;;  %p27_p8 = scmp.eq.s32.totalorder %s26_s9, 0 }
   0xf   : > { %p37_p9 = scmp.eq.s32.totalorder %s639_s21, 0  ;;  %p42_p10 = scmp.ne.s32.totalorder %s631_s19, %s627_s18 }
  0x10   : > { %456 = dma.hbm_to_vmem [thread:$0]  (!%p454_p6), %s175_s24, 2048, %s177_s28, [#allocation6], %s642_s29, %s642_s29, %s643_s30  }
  0x11   : > { %p150_p11 = scmp.eq.s32.totalorder %s698_s25, 1  ;;  %p730_p12 = por %p43_p1, %p42_p10 }
  0x12   : > { %s726_s10 = scalar_select %p27_p8, %s635_s20, %s29_s8  }
  0x13   : > { %p734_p13 = por %p150_p11, %p36_p7  ;;  %p156_p0 = scmp.eq.s32.totalorder %s431_s6, 1 }
  0x14   : > { %p38_p2 = por %p37_p9, %p36_p7  ;;  %s199_s13 = sand.u32 1, %s635_s20  }
  0x15   : > { %p739_p4 = por %p156_p0, %p42_p10  ;;  %p466_p6 = scmp.lt.s32.totalorder %s639_s21, 2 }
  0x16   : > { %s435_s15 = sshll.u32 %s199_s13, 3  ;;  %s436_s16 = sshll.u32 %s639_s21, 3 }
  0x17   : > { %s207_s23 = scalar_lea.hbm %s826_s0, %s436_s16  ;;  %s203_s27 = scalar_lea.vmem [#allocation2], %s435_s15 }
  0x18   : > { %s209_s24 = sshll.u32 %s207_s23, 4  ;;  %s211_s28 = sshll.u32 %s203_s27, 4  ;;  %s210_s24 = int_to_ptr.hbm [resolvable:$true] %s209_s24  ;;  %s212_s28 = int_to_ptr.vmem [resolvable:$true] %s211_s28 }
  0x19   : > { %p748_p8 = pnand %p466_p6, %p38_p2  ;;  %s200_s30 = scalar_lea.sflag [#allocation3], %s199_s13 }
  0x1a   : > { %s539_s6 = sshra.s32 %s210_s24, 4  ;;  %s546_s15 = scalar_lea.hbm %s826_s0, 16  ;;  %s540_s6 = int_to_ptr.hbm [resolvable:$true] %s539_s6 }
  0x1b   : > { %s541_s8 = scalar_lea.hbm %s540_s6, 8  ;;  %p543_p9 = pneg %p748_p8 }
  0x1c   : > { %p542_p7 = scmp.ne.s32.totalorder %s540_s6, %s541_s8  ;;  %p547_p0 = scmp.lt.s32.totalorder %s540_s6, %s826_s0 }
  0x1d   : > { %p548_p2 = scmp.lt.s32.totalorder %s546_s15, %s541_s8 }
  0x1e   : > { %p544_p10 = pnand %p543_p9, %p542_p7 }
  0x1f   : > { %p549_p6 = por %p548_p2, %p547_p0 }
  0x20   : > { %p545_p11 = pneg %p544_p10 }
  0x22   : > { %p550_p5 = pnand %p549_p6, %p545_p11 }
  0x24   : > { %553 = shalt.err (!%p550_p5)
}
  0x25   : > { %460 = dma.hbm_to_vmem [thread:$0]  (!%p748_p8), %s210_s24, 128, %s212_s28, %s200_s30  }
  0x26   : > { %220 = sbr.rel (%p703_p3) target bundleno = 476 (0x1dc), region = 40  ;;  %s765_s13 = sand.u32 (!%p703_p3), 1, %s631_s19  }
  0x27   : > { %s438_s23 = sshll.u32 (!%p703_p3), %s765_s13, 3  ;;  %s223_s27 = scalar_lea.sflag (!%p703_p3), [#allocation3], %s765_s13 }
  0x28   : > { %s771_s6 = scalar_lea.vmem (!%p703_p3), [#allocation2], %s438_s23 }
  0x2b   : > { %614 = dma.done.wait (%p730_p12), %s223_s27, 128  }
  0x2c   : > { %616 = vsyncadd (%p730_p12), %s223_s27, 4294967168 }
  0x2d   : > { %618 = dma.done.wait (%p43_p1), [#allocation6], 2048  }
  0x2e   : > { %620 = vsyncadd (%p43_p1), [#allocation6], 4294965248  ;;  %v275_v0 = vld [vmem:[#allocation5 + $0x78] sm:$0xff]  ;;  %v274_v1 = vld [vmem:[#allocation5 + $0x70] sm:$0xff]  ;;  %v306_v20 = vlaneseq  ;;  %s442_s24 = sshll.u32 %s698_s25, 3  ;;  %s258_s25 = scalar_lea.vmem [#allocation7], %s438_s23 }
  0x2f   : > { %280 = vmatpush.msra.mxu0 %v275_v0  ;;  %v273_v2 = vld [vmem:[#allocation5 + $0x68] sm:$0xff]  ;;  %v272_v3 = vld [vmem:[#allocation5 + $0x60] sm:$0xff]  ;;  %v271_v4 = vld [vmem:[#allocation5 + $0x58] sm:$0xff]  ;;  %s346_s9 = scalar_lea.hbm %s831_s5, %s442_s24  ;;  %s348_s17 = sshll.u32 %s258_s25, 4  ;;  %s349_s17 = int_to_ptr.vmem [resolvable:$true] %s348_s17 }
  0x30   : > { %v270_v5 = vld [vmem:[#allocation5 + $0x50] sm:$0xff]  ;;  %v269_v6 = vld [vmem:[#allocation5 + $0x48] sm:$0xff]  ;;  %v268_v7 = vld [vmem:[#allocation5 + $0x40] sm:$0xff]  ;;  %v307_v21 = vand.u32 127, %v306_v20  ;;  %s350_s22 = sshll.u32 %s346_s9, 4  ;;  %s336_s27 = scalar_lea.sflag [#allocation4], %s765_s13  ;;  %s351_s22 = int_to_ptr.hbm [resolvable:$true] %s350_s22 }
  0x31   : > { %281 = vmatpush.msra.mxu0 %v274_v1  ;;  %v267_v8 = vld [vmem:[#allocation5 + $0x38] sm:$0xff]  ;;  %v266_v9 = vld [vmem:[#allocation5 + $0x30] sm:$0xff]  ;;  %v265_v10 = vld [vmem:[#allocation5 + $0x28] sm:$0xff]  ;;  %s589_s28 = scalar_lea.hbm %s831_s5, 16 }
  0x32   : > { %v264_v11 = vld [vmem:[#allocation5 + $0x20] sm:$0xff]  ;;  %v263_v12 = vld [vmem:[#allocation5 + $0x18] sm:$0xff]  ;;  %v262_v13 = vld [vmem:[#allocation5 + $0x10] sm:$0xff]  ;;  %vm308_vm0 = vcmp.lt.s32.totalorder %v307_v21, 32 }
  0x33   : > { %282 = vmatpush.msra.mxu0 %v273_v2  ;;  %v261_v14 = vld [vmem:[#allocation5 + $0x8] sm:$0xff]  ;;  %v260_v15 = vld [vmem:[#allocation5] sm:$0xff]  ;;  %v259_v16 = vld [vmem:[%s771_s6] sm:$0xff]  ;;  %s583_s6 = sshra.s32 %s351_s22, 4  ;;  %s584_s6 = int_to_ptr.hbm [resolvable:$true] %s583_s6 }
  0x34   : > { %v504_v17 = vld [vmem:[%s828_s2] ss:$0 sm:$0xff]  ;;  %s585_s26 = scalar_lea.hbm %s584_s6, 8  ;;  %p590_p12 = scmp.lt.s32.totalorder %s584_s6, %s831_s5 }
  0x35   : > { %283 = vmatpush.msra.mxu0 %v272_v3  ;;  %v505_v36 = vld [vmem:[%s829_s3] ss:$0 sm:$0xff]  ;;  %p586_p1 = scmp.ne.s32.totalorder %s584_s6, %s585_s26  ;;  %p591_p8 = scmp.lt.s32.totalorder %s589_s28, %s585_s26 }
  0x36   : > { %v506_v39 = vld [vmem:[%s830_s4] ss:$0 sm:$0xff] }
  0x37   : > { %284 = vmatpush.msra.mxu0 %v271_v4  ;;  %p587_p3 = pnand %p586_p1, %p734_p13  ;;  %p592_p7 = por %p591_p8, %p590_p12 }
  0x39   : > { %285 = vmatpush.msra.mxu0 %v270_v5  ;;  %p588_p5 = pneg %p587_p3 }
  0x3b   : > { %286 = vmatpush.msra.mxu0 %v269_v6  ;;  %p593_p9 = pnand %p592_p7, %p588_p5 }
  0x3d   : > { %287 = vmatpush.msra.mxu0 %v268_v7 }
  0x3f   : > { %288 = vmatpush.msra.mxu0 %v267_v8 }
  0x41   : > { %289 = vmatpush.msra.mxu0 %v266_v9 }
  0x43   : > { %290 = vmatpush.msra.mxu0 %v265_v10 }
  0x45   : > { %291 = vmatpush.msra.mxu0 %v264_v11 }
  0x47   : > { %292 = vmatpush.msra.mxu0 %v263_v12 }
  0x49   : > { %293 = vmatpush.msra.mxu0 %v262_v13 }
  0x4b   : > { %294 = vmatpush.msra.mxu0 %v261_v14 }
  0x4d   : > { %295 = vmatpush.msra.mxu0 %v260_v15 }
  0x4e   : > { %296 = vmatmul.f32.vlgmr.msra.gmra.mxu0 %v259_v16 }
  0xcb   : > { %v297_v18 = vpop.f32.mrf.mxu0 }
  0xcc   : > { %v298_v19 = vadd.f32 %v504_v17, %v297_v18 }
  0xce   : > { %302 = vadd.xlane.f32.xlu0 %v298_v19 }
 0x141   : > { %v303_v22 = vpop.xlane.xlu0 %302 }
 0x142   : > { %v304_v23 = vmul.f32 0.03125, %v303_v22 }
 0x144   : > { %v305_v24 = vsub.f32 %v298_v19, %v304_v23 }
 0x146   : > { %v309_v25 = vsel %vm308_vm0, %v305_v24, 0.0 }
 0x147   : > { %v310_v26 = vmul.f32 %v309_v25, %v309_v25 }
 0x149   : > { %311 = vadd.xlane.f32.xlu0 %v310_v26 }
 0x1bc   : > { %v312_v27 = vpop.xlane.xlu0 %311 }
 0x1bd   : > { %v313_v28 = vmul.f32 0.03125, %v312_v27 }
 0x1bf   : > { %v314_v29 = vadd.f32 1e-05, %v313_v28 }
 0x1c1   : > { %507 = vrsqrt.f32 %v314_v29  ;;  %vm321_vm2 = vweird.f32 %v314_v29 }
 0x1c7   : > { %v508_v30 = vpop.eup %507 }
 0x1c8   : > { %v316_v31 = vmul.f32 %v508_v30, %v314_v29  ;;  %vm322_vm1 = vweird.f32 %v508_v30 }
 0x1c9   : > { %vm323_vm3 = vmor %vm321_vm2, %vm322_vm1 }
 0x1ca   : > { %v317_v32 = vmul.f32 %v508_v30, %v316_v31 }
 0x1cc   : > { %v318_v33 = vmul.f32 0.5, %v317_v32 }
 0x1ce   : > { %v319_v34 = vsub.f32 1.5, %v318_v33 }
 0x1d0   : > { %v320_v35 = vmul.f32 %v508_v30, %v319_v34 }
 0x1d2   : > { %v324_v37 = vsel %vm323_vm3, %v508_v30, %v320_v35 }
 0x1d3   : > { %v325_v38 = vmul.f32 %v324_v37, %v309_v25 }
 0x1d5   : > { %v329_v40 = vmul.f32 %v505_v36, %v325_v38 }
 0x1d7   : > { %v333_v41 = vadd.f32 %v506_v39, %v329_v40 }
 0x1d9   : > { %334 = vst [vmem:[%s258_s25] sm:$0xff] %v333_v41 }
 0x1da   : > { %596 = shalt.err (!%p593_p9)
}
 0x1db   : > { %451 = dma.vmem_to_hbm [thread:$0]  (%p734_p13), %s349_s17, 128, %s351_s22, %s336_s27  }
 0x1dc PF: > { %s362_s13 = sand.u32 1, %s627_s18   ;;  %p837_p10 = scmp.ge.s32.totalorder %s639_s21, 2 }
 0x1dd   : > { %s363_s30 = scalar_lea.sflag [#allocation4], %s362_s13 }
 0x1de   : > { %p462_p11 = pnand %p837_p10, %p739_p4 }
 0x1e0   : > { %p463_p0 = pneg %p462_p11 }
 0x1e2   : > { %622 = dma.done.wait (%p463_p0), %s363_s30, 128  }
 0x1e3   : > { %624 = vsyncadd (%p463_p0), %s363_s30, 4294967168  ;;  %p19_p2 = scmp.ge.s32.totalorder %s714_s7, 4   ;;  %s838_s18 = smov %s631_s19 }
 0x1e4   : > { %s839_s19 = smov %s635_s20  ;;  %s840_s20 = smov %s726_s10 }
 0x1e5   : > { %s841_s21 = smov %s714_s7  ;;  %21 = sbr.rel (!%p19_p2) target bundleno = 6 (0x6), region = 89 }
 0x1ea   :  { %369 = vsyncpa [#allocation3], 1 }
 0x1eb   :  { %371 = vsyncpa [#allocation3 + $0x1], 1 }
 0x1ec   :  { %372 = vsyncpa [#allocation6], 1 }
 0x1ed   :  { %373 = vsyncpa [#allocation4], 1 }
 0x1ee   :  { %375 = vsyncpa [#allocation4 + $0x1], 1 }

</bundles_post_ra>
